<compile_context>
chip_gen: v7x
topology: tpu7x:2x2x1
jax: 0.10.0
libtpu: 0.0.40
codegen_flags: <defaults>
</compile_context>

<pallas_src>
import functools
import math

import jax
import jax.numpy as jnp
from jax.experimental import pallas as pl
from jax.experimental.pallas import tpu as pltpu


def _round_up(x: int, m: int) -> int:
    return ((x + m - 1) // m) * m


def _lightconv_kernel(adj_ref, feat_ref, src_scale_ref, dst_scale_ref,
                      out_ref, acc_ref, *, norm: str):
    """One (i, j, k) grid step of rst = D_in^s * A * D_out^s * feat.

    adj_ref:       [tm, tk] bf16   (rows = dst tile i, cols = src tile k)
    feat_ref:      [tk, tn] f32
    src_scale_ref: [tk, 1]  f32    out_degree^-0.5 (or 1.0)
    dst_scale_ref: [tm, 1]  f32    in_degree^-0.5 / 1/in_degree (or 1.0)
    out_ref:       [tm, tn]        written on the last k step
    acc_ref:       [tm, tn] f32    VMEM accumulator, resident across k
    """
    k = pl.program_id(2)

    @pl.when(k == 0)
    def _():
        acc_ref[...] = jnp.zeros_like(acc_ref)

    # bf16 0/1 adjacency -> f32 (exact); MXU matmul accumulates in f32.
    a = adj_ref[...].astype(jnp.float32)
    f = feat_ref[...].astype(jnp.float32)
    if norm == "both":
        # Apply out-degree norm to the (small) feature tile, not the adjacency.
        f = f * src_scale_ref[...]

    acc_ref[...] += jnp.dot(a, f, preferred_element_type=jnp.float32)

    @pl.when(k == pl.num_programs(2) - 1)
    def _():
        r = acc_ref[...]
        if norm != "none":
            r = r * dst_scale_ref[...]
        out_ref[...] = r.astype(out_ref.dtype)


def lightconv_forward(adj, feat, norm: str = "both", *,
                      tm: int = 256, tn: int = 512, tk: int = 512):
    """Pallas LightConv forward. adj: [N, N] (dst x src), feat: [N, F]."""
    n_dst, n_src = adj.shape
    n_nodes, n_feats = feat.shape
    assert n_dst == n_src == n_nodes

    # --- degree normalization vectors (must be global -> computed in wrapper).
    adj_f32 = adj.astype(jnp.float32)
    out_deg = jnp.maximum(jnp.sum(adj_f32, axis=0), 1.0)   # [N] out-deg of src
    in_deg = jnp.maximum(jnp.sum(adj_f32, axis=1), 1.0)    # [N] in-deg of dst
    if norm == "both":
        src_scale = jax.lax.rsqrt(out_deg)
        dst_scale = jax.lax.rsqrt(in_deg)
    elif norm == "none":
        src_scale = jnp.ones_like(out_deg)
        dst_scale = jnp.ones_like(in_deg)
    else:  # 'right'
        src_scale = jnp.ones_like(out_deg)
        dst_scale = 1.0 / in_deg

    # --- tile sizes (128-aligned; shrink for small problems).
    tm = min(tm, _round_up(n_nodes, 128))
    tk = min(tk, _round_up(n_nodes, 128))
    tn = min(tn, _round_up(n_feats, 128))

    nm = _round_up(n_nodes, tm)   # padded dst extent
    nk = _round_up(n_nodes, tk)   # padded src extent
    fp = _round_up(n_feats, tn)   # padded (lane-dense) feature extent

    # --- zero-padded, lane-dense inputs. bf16 adjacency: 0/1 is exact, halves
    # HBM traffic of the dominant operand.
    adj_p = jnp.pad(adj.astype(jnp.bfloat16),
                    ((0, nm - n_nodes), (0, nk - n_nodes)))
    feat_p = jnp.pad(feat.astype(jnp.float32),
                     ((0, nk - n_nodes), (0, fp - n_feats)))
    src_p = jnp.pad(src_scale.astype(jnp.float32)[:, None],
                    ((0, nk - n_nodes), (0, 0)))
    dst_p = jnp.pad(dst_scale.astype(jnp.float32)[:, None],
                    ((0, nm - n_nodes), (0, 0)))

    # --- explicit VMEM budget (double-buffered inputs/outputs + accumulator),
    # with headroom; stays well under the 64 MiB v7x ceiling at default tiles.
    vmem_bytes = (
        2 * tm * tk * 2              # adj tiles (bf16), double-buffered
        + 2 * tk * tn * 4            # feat tiles (f32)
        + 2 * (tk + tm) * 128 * 4    # scale columns (lane-padded in VMEM)
        + 2 * tm * tn * 4            # output tiles
        + tm * tn * 4                # accumulator scratch
    )
    vmem_limit = int(min(100 * 2**20, max(32 * 2**20, 2 * vmem_bytes)))

    kernel = functools.partial(_lightconv_kernel, norm=norm)

    out_p = pl.pallas_call(
        kernel,
        out_shape=jax.ShapeDtypeStruct((nm, fp), feat.dtype),
        grid_spec=pltpu.PrefetchScalarGridSpec(
            num_scalar_prefetch=0,
            grid=(nm // tm, fp // tn, nk // tk),   # reduction (src/K) axis last
            in_specs=[
                pl.BlockSpec((tm, tk), lambda i, j, k: (i, k)),  # adj
                pl.BlockSpec((tk, tn), lambda i, j, k: (k, j)),  # feat
                pl.BlockSpec((tk, 1), lambda i, j, k: (k, 0)),   # src scale
                pl.BlockSpec((tm, 1), lambda i, j, k: (i, 0)),   # dst scale
            ],
            out_specs=pl.BlockSpec((tm, tn), lambda i, j, k: (i, j)),
            scratch_shapes=[pltpu.VMEM((tm, tn), jnp.float32)],
        ),
        compiler_params=pltpu.CompilerParams(
            dimension_semantics=("parallel", "parallel", "arbitrary"),
            vmem_limit_bytes=vmem_limit,
        ),
    )(adj_p, feat_p, src_p, dst_p)

    return out_p[:n_nodes, :n_feats]


def init_lightconv_params(key, in_feats, out_feats):
    """Deterministic xavier_uniform init of msg/neighbor Linear weights.

    NOTE: these parameters exist in the PyTorch module's __init__ but are
    never used in its forward(), so they do not enter the kernel.
    """
    k1, k2, k3, k4 = jax.random.split(key, 4)
    bound_w = math.sqrt(6.0 / (in_feats + out_feats))
    bound_b = 1.0 / math.sqrt(in_feats)
    return {
        "msg_weight": {
            "w": jax.random.uniform(k1, (out_feats, in_feats), jnp.float32,
                                    -bound_w, bound_w),
            "b": jax.random.uniform(k2, (out_feats,), jnp.float32,
                                    -bound_b, bound_b),
        },
        "neighbor_weight": {
            "w": jax.random.uniform(k3, (out_feats, in_feats), jnp.float32,
                                    -bound_w, bound_w),
            "b": jax.random.uniform(k4, (out_feats,), jnp.float32,
                                    -bound_b, bound_b),
        },
    }


def lightconv_reference(adj, feat, norm: str = "both"):
    """Pure-JAX reference mirroring the PyTorch/DGL forward."""
    out_deg = jnp.maximum(adj.sum(axis=0), 1.0)
    in_deg = jnp.maximum(adj.sum(axis=1), 1.0)
    x = feat
    if norm == "both":
        x = x * jnp.power(out_deg, -0.5)[:, None]
    rst = adj @ x
    if norm != "none":
        if norm == "both":
            scale = jnp.power(in_deg, -0.5)
        else:
            scale = 1.0 / in_deg
        rst = rst * scale[:, None]
    return rst


if __name__ == "__main__":
    N = 16          # number of graph nodes
    IN_FEATS = 32   # forward output also has in_feats columns (Linears unused)
    OUT_FEATS = 32
    NORM = "both"

    key = jax.random.PRNGKey(0)
    k_adj, k_feat, k_params = jax.random.split(key, 3)

    # Random 0/1 adjacency (dst x src) and node features.
    adj = (jax.random.uniform(k_adj, (N, N)) < 0.3).astype(jnp.float32)
    feat = jax.random.normal(k_feat, (N, IN_FEATS), dtype=jnp.float32)

    # Parameters exist for fidelity with __init__ but are unused in forward.
    _params = init_lightconv_params(k_params, IN_FEATS, OUT_FEATS)

    out = lightconv_forward(adj, feat, norm=NORM)
    out = jax.block_until_ready(out)

    ref = lightconv_reference(adj, feat, norm=NORM)
    assert out.shape == (N, IN_FEATS)
    assert jnp.allclose(out, ref, rtol=1e-4, atol=1e-5), "mismatch vs reference"

    print("KERNEL_OK")
</pallas_src>

<mosaic_0001>
module attributes {stable_mosaic.version = 11 : i64} {
  func.func @_lightconv_kernel(%arg0: i32, %arg1: i32, %arg2: i32, %arg3: memref<128x128xbf16, #tpu.memory_space<vmem>>, %arg4: memref<128x128xf32, #tpu.memory_space<vmem>>, %arg5: memref<128x1xf32, #tpu.memory_space<vmem>>, %arg6: memref<128x1xf32, #tpu.memory_space<vmem>>, %arg7: memref<128x128xf32, #tpu.memory_space<vmem>>, %arg8: memref<128x128xf32, #tpu.memory_space<vmem>>) attributes {dimension_semantics = [#tpu.dimension_semantics<parallel>, #tpu.dimension_semantics<parallel>, #tpu.dimension_semantics<arbitrary>], iteration_bounds = array<i64: 1, 1, 1>, scalar_prefetch = 0 : i64, scratch_operands = 1 : i64, tpu.core_type = #tpu.core_type<tc>, window_params = [{transform_indices = @transform_0, window_bounds = array<i64: 128, 128>}, {transform_indices = @transform_1, window_bounds = array<i64: 128, 128>}, {transform_indices = @transform_2, window_bounds = array<i64: 128, 1>}, {transform_indices = @transform_3, window_bounds = array<i64: 128, 1>}, {transform_indices = @transform_4, window_bounds = array<i64: 128, 128>}]} {
    %c0_i32 = arith.constant 0 : i32
    %0 = arith.cmpi eq, %arg2, %c0_i32 : i32
    %1 = arith.extui %0 : i1 to i32
    %c0_i32_0 = arith.constant 0 : i32
    %2 = arith.cmpi ne, %1, %c0_i32_0 : i32
    scf.if %2 {
      %cst_12 = arith.constant 0.000000e+00 : f32
      %16 = vector.broadcast %cst_12 : f32 to vector<128x128xf32>
      %c0_13 = arith.constant 0 : index
      %c0_14 = arith.constant 0 : index
      %17 = vector.load %arg8[%c0_13, %c0_14] : memref<128x128xf32, #tpu.memory_space<vmem>>, vector<128x128xf32>
      tpu.vector_store %arg8[%c0_13, %c0_14], %16 {strides = array<i32>} : memref<128x128xf32, #tpu.memory_space<vmem>>, vector<128x128xf32>,
    } else {
    }
    %c0 = arith.constant 0 : index
    %c0_1 = arith.constant 0 : index
    %3 = vector.load %arg3[%c0, %c0_1] : memref<128x128xbf16, #tpu.memory_space<vmem>>, vector<128x128xbf16>
    %4 = arith.extf %3 : vector<128x128xbf16> to vector<128x128xf32>
    %c0_2 = arith.constant 0 : index
    %c0_3 = arith.constant 0 : index
    %5 = vector.load %arg4[%c0_2, %c0_3] : memref<128x128xf32, #tpu.memory_space<vmem>>, vector<128x128xf32>
    %c0_4 = arith.constant 0 : index
    %c0_5 = arith.constant 0 : index
    %6 = vector.load %arg5[%c0_4, %c0_5] : memref<128x1xf32, #tpu.memory_space<vmem>>, vector<128x1xf32>
    %7 = vector.broadcast %6 : vector<128x1xf32> to vector<128x128xf32>
    %8 = arith.mulf %5, %7 : vector<128x128xf32>
    %c0_6 = arith.constant 0 : index
    %c0_7 = arith.constant 0 : index
    %9 = vector.load %arg8[%c0_6, %c0_7] : memref<128x128xf32, #tpu.memory_space<vmem>>, vector<128x128xf32>
    %cst = arith.constant dense<0.000000e+00> : vector<128x128xf32>
    %10 = tpu.matmul %4, %8, %cst {dimension_numbers = #tpu.dot_dimension_numbers<[1], [0], [0], [1], [0, 0, 1, 1], [], []>} : vector<128x128xf32>, vector<128x128xf32>, vector<128x128xf32> -> vector<128x128xf32>
    %11 = arith.addf %9, %10 : vector<128x128xf32>
    %c0_8 = arith.constant 0 : index
    %c0_9 = arith.constant 0 : index
    %12 = vector.load %arg8[%c0_8, %c0_9] : memref<128x128xf32, #tpu.memory_space<vmem>>, vector<128x128xf32>
    tpu.vector_store %arg8[%c0_8, %c0_9], %11 {strides = array<i32>} : memref<128x128xf32, #tpu.memory_space<vmem>>, vector<128x128xf32>,
    %c0_i32_10 = arith.constant 0 : i32
    %13 = arith.cmpi eq, %arg2, %c0_i32_10 : i32
    %14 = arith.extui %13 : i1 to i32
    %c0_i32_11 = arith.constant 0 : i32
    %15 = arith.cmpi ne, %14, %c0_i32_11 : i32
    scf.if %15 {
      %c0_12 = arith.constant 0 : index
      %c0_13 = arith.constant 0 : index
      %16 = vector.load %arg8[%c0_12, %c0_13] : memref<128x128xf32, #tpu.memory_space<vmem>>, vector<128x128xf32>
      %c0_14 = arith.constant 0 : index
      %c0_15 = arith.constant 0 : index
      %17 = vector.load %arg6[%c0_14, %c0_15] : memref<128x1xf32, #tpu.memory_space<vmem>>, vector<128x1xf32>
      %18 = vector.broadcast %17 : vector<128x1xf32> to vector<128x128xf32>
      %19 = arith.mulf %16, %18 : vector<128x128xf32>
      %c0_16 = arith.constant 0 : index
      %c0_17 = arith.constant 0 : index
      %20 = vector.load %arg7[%c0_16, %c0_17] : memref<128x128xf32, #tpu.memory_space<vmem>>, vector<128x128xf32>
      tpu.vector_store %arg7[%c0_16, %c0_17], %19 {strides = array<i32>} : memref<128x128xf32, #tpu.memory_space<vmem>>, vector<128x128xf32>,
    } else {
    }
    return
  }
  func.func @transform_0(%arg0: i32, %arg1: i32, %arg2: i32) -> (i32, i32) {
    %c0_i32 = arith.constant 0 : i32
    return %arg0, %arg2 : i32, i32
  }
  func.func @transform_1(%arg0: i32, %arg1: i32, %arg2: i32) -> (i32, i32) {
    %c0_i32 = arith.constant 0 : i32
    return %arg2, %arg1 : i32, i32
  }
  func.func @transform_2(%arg0: i32, %arg1: i32, %arg2: i32) -> (i32, i32) {
    %c0_i32 = arith.constant 0 : i32
    %c0_i32_0 = arith.constant 0 : i32
    return %arg2, %c0_i32 : i32, i32
  }
  func.func @transform_3(%arg0: i32, %arg1: i32, %arg2: i32) -> (i32, i32) {
    %c0_i32 = arith.constant 0 : i32
    %c0_i32_0 = arith.constant 0 : i32
    return %arg0, %c0_i32 : i32, i32
  }
  func.func @transform_4(%arg0: i32, %arg1: i32, %arg2: i32) -> (i32, i32) {
    %c0_i32 = arith.constant 0 : i32
    return %arg0, %arg1 : i32, i32
  }
}

</mosaic_0001>

<bundles_post_ra>
// kernel: tpu_custom_call.1
= control target key start
LH: loop header
LB: loop body
LE: loop exit
PB: predicated region body
PF: predicated region fallthrough
CT: control target
= control target key end

     0   :  { %v759_v2 = vmov 0   ;;  %s976_s0 = inlined_call_operand.vmem [shape: bf16[128,128], index: 0, kind: input, shape index: {}]   ;;  %s977_s1 = inlined_call_operand.vmem [shape: f32[128,128], index: 1, kind: input, shape index: {}]   ;;  %s978_s2 = inlined_call_operand.vmem [shape: f32[128,1], index: 2, kind: input, shape index: {}]   ;;  %s979_s3 = inlined_call_operand.vmem [shape: f32[128,1], index: 3, kind: input, shape index: {}]   ;;  %s980_s4 = inlined_call_operand.hbm [shape: f32[128,128], index: 4, kind: output, shape index: {}]  }
   0x1   :  { %v88_v0 = vld [vmem:[%s978_s2 + $0x10] sm:$0xff]  ;;  %v86_v1 = vld [vmem:[%s978_s2] sm:$0xff]  ;;  %734 = vset.pattern.permute.xlu1 %v759_v2  ;;  %733 = vset.pattern.permute.xlu0 %v759_v2  ;;  %v89_v3 = vld [vmem:[%s978_s2 + $0x18] sm:$0xff] }
   0x2   :  { %114 = vperm.xlu1 %734, %v88_v0   ;;  %104 = vperm.xlu0 %733, %v86_v1   ;;  %v87_v4 = vld [vmem:[%s978_s2 + $0x8] sm:$0xff]  ;;  %v90_v6 = vld [vmem:[%s978_s2 + $0x20] sm:$0xff]  ;;  %v93_v7 = vld [vmem:[%s978_s2 + $0x38] sm:$0xff] }
   0x3   :  { %v91_v5 = vld [vmem:[%s978_s2 + $0x28] sm:$0xff]  ;;  %v92_v8 = vld [vmem:[%s978_s2 + $0x30] sm:$0xff] }
   0x6   :  { %119 = vperm.xlu1 %734, %v89_v3   ;;  %109 = vperm.xlu0 %733, %v87_v4  }
   0xa   :  { %129 = vperm.xlu1 %734, %v91_v5   ;;  %124 = vperm.xlu0 %733, %v90_v6  }
   0xb   :  { %9 = vsyncpa [#allocation4], 0  ;;  %v95_v9 = vld [vmem:[%s978_s2 + $0x48] sm:$0xff]  ;;  %v94_v10 = vld [vmem:[%s978_s2 + $0x40] sm:$0xff] }
   0xc   :  { %v97_v11 = vld [vmem:[%s978_s2 + $0x58] sm:$0xff]  ;;  %v96_v12 = vld [vmem:[%s978_s2 + $0x50] sm:$0xff]  ;;  %v99_v13 = vld [vmem:[%s978_s2 + $0x68] sm:$0xff] }
   0xd   :  { %v98_v14 = vld [vmem:[%s978_s2 + $0x60] sm:$0xff]  ;;  %v101_v15 = vld [vmem:[%s978_s2 + $0x78] sm:$0xff]  ;;  %v100_v16 = vld [vmem:[%s978_s2 + $0x70] sm:$0xff] }
   0xe   :  { %139 = vperm.xlu1 %734, %v93_v7   ;;  %134 = vperm.xlu0 %733, %v92_v8   ;;  %v411_v17 = vld [vmem:[%s979_s3 + $0x8] sm:$0xff]  ;;  %v410_v18 = vld [vmem:[%s979_s3] sm:$0xff]  ;;  %v413_v19 = vld [vmem:[%s979_s3 + $0x18] sm:$0xff] }
   0xf   :  { %v412_v20 = vld [vmem:[%s979_s3 + $0x10] sm:$0xff]  ;;  %v851_v21 = vld [vmem:[%s976_s0] sm:$0xff]   ;;  %v415_v23 = vld [vmem:[%s979_s3 + $0x28] sm:$0xff] }
  0x10   :  { %v856_v22 = vld [vmem:[%s976_s0 + $0x20] sm:$0xff]   ;;  %v556_v25 = vunpack.c.l.bf16 %v851_v21  ;;  %v417_v27 = vld [vmem:[%s979_s3 + $0x38] sm:$0xff]  ;;  %v416_v28 = vld [vmem:[%s979_s3 + $0x30] sm:$0xff] }
  0x11   :  { %v414_v24 = vld [vmem:[%s979_s3 + $0x20] sm:$0xff]  ;;  %v572_v26 = vunpack.c.l.bf16 %v856_v22  ;;  %v419_v29 = vld [vmem:[%s979_s3 + $0x48] sm:$0xff]  ;;  %v421_v31 = vld [vmem:[%s979_s3 + $0x58] sm:$0xff] }
  0x12   :  { %149 = vperm.xlu1 %734, %v95_v9   ;;  %144 = vperm.xlu0 %733, %v94_v10   ;;  %v418_v30 = vld [vmem:[%s979_s3 + $0x40] sm:$0xff]  ;;  %v420_v32 = vld [vmem:[%s979_s3 + $0x50] sm:$0xff]  ;;  %v423_v33 = vld [vmem:[%s979_s3 + $0x68] sm:$0xff] }
  0x13   :  { %657 = vmatprep.mubr.f32.mxu0 %v556_v25  ;;  %669 = vmatprep.mubr.f32.mxu1 %v572_v26  ;;  %v422_v34 = vld [vmem:[%s979_s3 + $0x60] sm:$0xff]  ;;  %v425_v35 = vld [vmem:[%s979_s3 + $0x78] sm:$0xff]  ;;  %v424_v36 = vld [vmem:[%s979_s3 + $0x70] sm:$0xff] }
  0x14   :  { %v72_v39 = vld [vmem:[%s977_s1 + $0x10] sm:$0xff]  ;;  %v70_v40 = vld [vmem:[%s977_s1] sm:$0xff]  ;;  %v73_v41 = vld [vmem:[%s977_s1 + $0x18] sm:$0xff] }
  0x15   :  { %v71_v42 = vld [vmem:[%s977_s1 + $0x8] sm:$0xff]  ;;  %v74_v50 = vld [vmem:[%s977_s1 + $0x20] sm:$0xff]  ;;  %v77_v57 = vld [vmem:[%s977_s1 + $0x38] sm:$0xff] }
  0x16   :  { %159 = vperm.xlu1 %734, %v97_v11   ;;  %154 = vperm.xlu0 %733, %v96_v12   ;;  %v75_v49 = vld [vmem:[%s977_s1 + $0x28] sm:$0xff]  ;;  %v76_v58 = vld [vmem:[%s977_s1 + $0x30] sm:$0xff]  ;;  %v78_v1 = vld [vmem:[%s977_s1 + $0x40] sm:$0xff] }
  0x17   :  { %v79_v0 = vld [vmem:[%s977_s1 + $0x48] sm:$0xff]  ;;  %v81_v7 = vld [vmem:[%s977_s1 + $0x58] sm:$0xff]  ;;  %v80_v8 = vld [vmem:[%s977_s1 + $0x50] sm:$0xff] }
  0x1a   :  { %169 = vperm.xlu1 %734, %v99_v13   ;;  %164 = vperm.xlu0 %733, %v98_v14   ;;  %v83_v14 = vld [vmem:[%s977_s1 + $0x68] sm:$0xff] }
  0x1e   :  { %179 = vperm.xlu1 %734, %v101_v15   ;;  %174 = vperm.xlu0 %733, %v100_v16   ;;  %v82_v15 = vld [vmem:[%s977_s1 + $0x60] sm:$0xff] }
  0x22   :  { %433 = vperm.xlu1 %734, %v411_v17   ;;  %428 = vperm.xlu0 %733, %v410_v18  }
  0x26   :  { %443 = vperm.xlu1 %734, %v413_v19   ;;  %438 = vperm.xlu0 %733, %v412_v20  }
  0x2a   :  { %453 = vperm.xlu1 %734, %v415_v23   ;;  %448 = vperm.xlu0 %733, %v414_v24   ;;  %v85_v23 = vld [vmem:[%s977_s1 + $0x78] sm:$0xff]  ;;  %v84_v24 = vld [vmem:[%s977_s1 + $0x70] sm:$0xff] }
  0x2e   :  { %463 = vperm.xlu1 %734, %v417_v27   ;;  %458 = vperm.xlu0 %733, %v416_v28  }
  0x32   :  { %473 = vperm.xlu1 %734, %v419_v29   ;;  %468 = vperm.xlu0 %733, %v418_v30  }
  0x36   :  { %483 = vperm.xlu1 %734, %v421_v31   ;;  %478 = vperm.xlu0 %733, %v420_v32   ;;  %v586_v31 = vld [vmem:[%s976_s0 + $0x8] sm:$0xff]  }
  0x37   :  { %v590_v32 = vld [vmem:[%s976_s0 + $0x28] sm:$0xff]  }
  0x3a   :  { %493 = vperm.xlu1 %734, %v423_v33   ;;  %488 = vperm.xlu0 %733, %v422_v34   ;;  %v557_v33 = vunpack.c.h.bf16 %v851_v21  ;;  %v573_v34 = vunpack.c.h.bf16 %v856_v22 }
  0x3e   :  { %503 = vperm.xlu1 %734, %v425_v35   ;;  %498 = vperm.xlu0 %733, %v424_v36   ;;  %v560_v35 = vunpack.c.l.bf16 %v586_v31  ;;  %v576_v36 = vunpack.c.l.bf16 %v590_v32 }
  0x81   :  { %v115_v37 = vpop.permute.xlu1 %114  ;;  %v105_v38 = vpop.permute.xlu0 %104 }
  0x82   :  { %v184_v45 = vmul.f32 %v115_v37, %v72_v39  ;;  %v182_v46 = vmul.f32 %v105_v38, %v70_v40  ;;  %v587_v37 = vld [vmem:[%s976_s0 + $0x10] sm:$0xff]   ;;  %v561_v39 = vunpack.c.h.bf16 %v586_v31  ;;  %v577_v40 = vunpack.c.h.bf16 %v590_v32 }
  0x83   :  { %v591_v38 = vld [vmem:[%s976_s0 + $0x30] sm:$0xff]   ;;  %v564_v21 = vunpack.c.l.bf16 %v587_v37 }
  0x84   :  { %v580_v22 = vunpack.c.l.bf16 %v591_v38 }
  0x85   :  { %v120_v43 = vpop.permute.xlu1 %119  ;;  %v110_v44 = vpop.permute.xlu0 %109 }
  0x86   :  { %v185_v47 = vmul.f32 %v120_v43, %v73_v41  ;;  %v183_v48 = vmul.f32 %v110_v44, %v71_v42  ;;  %v588_v41 = vld [vmem:[%s976_s0 + $0x18] sm:$0xff]   ;;  %v565_v43 = vunpack.c.h.bf16 %v587_v37  ;;  %v581_v44 = vunpack.c.h.bf16 %v591_v38 }
  0x87   :  { %v592_v42 = vld [vmem:[%s976_s0 + $0x38] sm:$0xff]   ;;  %s760_s0 = smov [#allocation3]  }
  0x88   :  { %v681_v51 = vpack.c.bf16 %v183_v48, %v182_v46  ;;  %v685_v54 = vpack.c.bf16 %v185_v47, %v184_v45  ;;  %v568_v45 = vunpack.c.l.bf16 %v588_v41  ;;  %v584_v46 = vunpack.c.l.bf16 %v592_v42  ;;  %s543_s17 = sshll.u32 %s760_s0, 4  ;;  %s544_s17 = int_to_ptr.vmem [resolvable:$true] %s543_s17 }
  0x89   :  { %v130_v52 = vpop.permute.xlu1 %129  ;;  %v125_v53 = vpop.permute.xlu0 %124  ;;  %v569_v47 = vunpack.c.h.bf16 %v588_v41  ;;  %v585_v48 = vunpack.c.h.bf16 %v592_v42  ;;  %s735_s18 = scalar_lea.vmem %s544_s17, 2048  ;;  %p740_p1 = scmp.lt.s32.totalorder %s544_s17, %s544_s17 }
  0x8a   :  { %v187_v55 = vmul.f32 %v130_v52, %v75_v49  ;;  %v186_v56 = vmul.f32 %v125_v53, %v74_v50  ;;  %682 = vmatprep.subr.bf16.mxu0 %v681_v51  ;;  %713 = vmatprep.subr.bf16.mxu1 %v681_v51  ;;  %p736_p0 = scmp.ne.s32.totalorder %s544_s17, %s735_s18  ;;  %p741_p2 = scmp.lt.s32.totalorder %s735_s18, %s735_s18 }
  0x8b   :  { %684 = vmatpush3.bf16.msra.mxu0 %v681_v51  ;;  %721 = vmatpush3.bf16.msra.mxu1 %v681_v51 }
  0x8c   :  { %686 = vmatprep.subr.bf16.mxu0 %v685_v54  ;;  %714 = vmatprep.subr.bf16.mxu1 %v685_v54  ;;  %v689_v61 = vpack.c.bf16 %v187_v55, %v186_v56  ;;  %p742_p3 = por %p741_p2, %p740_p1 }
  0x8d   :  { %v140_v59 = vpop.permute.xlu1 %139  ;;  %v135_v60 = vpop.permute.xlu0 %134 }
  0x8e   :  { %v189_v62 = vmul.f32 %v140_v59, %v77_v57  ;;  %v188_v63 = vmul.f32 %v135_v60, %v76_v58  ;;  %p743_p4 = pnand %p742_p3, %p736_p0 }
  0x8f   :  { %688 = vmatpush3.bf16.msra.mxu0 %v685_v54  ;;  %722 = vmatpush3.bf16.msra.mxu1 %v685_v54 }
  0x90   :  { %690 = vmatprep.subr.bf16.mxu0 %v689_v61  ;;  %715 = vmatprep.subr.bf16.mxu1 %v689_v61  ;;  %v693_v4 = vpack.c.bf16 %v189_v62, %v188_v63 }
  0x91   :  { %v150_v2 = vpop.permute.xlu1 %149  ;;  %v145_v3 = vpop.permute.xlu0 %144 }
  0x92   :  { %v191_v5 = vmul.f32 %v150_v2, %v79_v0  ;;  %v190_v6 = vmul.f32 %v145_v3, %v78_v1 }
  0x93   :  { %692 = vmatpush3.bf16.msra.mxu0 %v689_v61  ;;  %723 = vmatpush3.bf16.msra.mxu1 %v689_v61 }
  0x94   :  { %694 = vmatprep.subr.bf16.mxu0 %v693_v4  ;;  %716 = vmatprep.subr.bf16.mxu1 %v693_v4  ;;  %v697_v11 = vpack.c.bf16 %v191_v5, %v190_v6 }
  0x95   :  { %v160_v9 = vpop.permute.xlu1 %159  ;;  %v155_v10 = vpop.permute.xlu0 %154 }
  0x96   :  { %v193_v12 = vmul.f32 %v160_v9, %v81_v7  ;;  %v192_v13 = vmul.f32 %v155_v10, %v80_v8 }
  0x97   :  { %696 = vmatpush3.bf16.msra.mxu0 %v693_v4  ;;  %724 = vmatpush3.bf16.msra.mxu1 %v693_v4 }
  0x98   :  { %698 = vmatprep.subr.bf16.mxu0 %v697_v11  ;;  %717 = vmatprep.subr.bf16.mxu1 %v697_v11  ;;  %v701_v18 = vpack.c.bf16 %v193_v12, %v192_v13 }
  0x99   :  { %v170_v16 = vpop.permute.xlu1 %169  ;;  %v165_v17 = vpop.permute.xlu0 %164 }
  0x9a   :  { %v195_v19 = vmul.f32 %v170_v16, %v83_v14  ;;  %v194_v20 = vmul.f32 %v165_v17, %v82_v15 }
  0x9b   :  { %700 = vmatpush3.bf16.msra.mxu0 %v697_v11  ;;  %725 = vmatpush3.bf16.msra.mxu1 %v697_v11 }
  0x9c   :  { %702 = vmatprep.subr.bf16.mxu0 %v701_v18  ;;  %718 = vmatprep.subr.bf16.mxu1 %v701_v18  ;;  %v705_v27 = vpack.c.bf16 %v195_v19, %v194_v20 }
  0x9d   :  { %v180_v25 = vpop.permute.xlu1 %179  ;;  %v175_v26 = vpop.permute.xlu0 %174 }
  0x9e   :  { %v197_v28 = vmul.f32 %v180_v25, %v85_v23  ;;  %v196_v29 = vmul.f32 %v175_v26, %v84_v24 }
  0x9f   :  { %704 = vmatpush3.bf16.msra.mxu0 %v701_v18  ;;  %726 = vmatpush3.bf16.msra.mxu1 %v701_v18 }
  0xa0   :  { %706 = vmatprep.subr.bf16.mxu0 %v705_v27  ;;  %719 = vmatprep.subr.bf16.mxu1 %v705_v27  ;;  %v709_v30 = vpack.c.bf16 %v197_v28, %v196_v29 }
  0xa1   :  { %v434_v49 = vpop.permute.xlu1 %433  ;;  %v429_v50 = vpop.permute.xlu0 %428 }
  0xa3   :  { %708 = vmatpush3.bf16.msra.mxu0 %v705_v27  ;;  %727 = vmatpush3.bf16.msra.mxu1 %v705_v27 }
  0xa4   :  { %710 = vmatprep.subr.bf16.mxu0 %v709_v30  ;;  %720 = vmatprep.subr.bf16.mxu1 %v709_v30 }
  0xa5   :  { %v444_v51 = vpop.permute.xlu1 %443  ;;  %v439_v52 = vpop.permute.xlu0 %438 }
  0xa7   :  { %712 = vmatpush3.bf16.msra.mxu0 %v709_v30  ;;  %728 = vmatpush3.bf16.msra.mxu1 %v709_v30 }
  0xa9   :  { %v454_v53 = vpop.permute.xlu1 %453  ;;  %v449_v54 = vpop.permute.xlu0 %448 }
  0xaa   :  { %658 = vmatmul.mubr.f32.vlgmr.msra.gmra.mrb[0].mxu0 %v557_v33  ;;  %670 = vmatmul.mubr.f32.vlgmr.msra.gmra.mrb[0].mxu1 %v573_v34 }
  0xab   :  { %660 = vmatprep.mubr.f32.mxu0 %v560_v35  ;;  %672 = vmatprep.mubr.f32.mxu1 %v576_v36 }
  0xad   :  { %v464_v55 = vpop.permute.xlu1 %463  ;;  %v459_v56 = vpop.permute.xlu0 %458 }
  0xae   :  { %661 = vmatmul.mubr.f32.gmra.mrb[2].mxu0 %v561_v39  ;;  %673 = vmatmul.mubr.f32.gmra.mrb[2].mxu1 %v577_v40 }
  0xaf   :  { %663 = vmatprep.mubr.f32.mxu0 %v564_v21  ;;  %675 = vmatprep.mubr.f32.mxu1 %v580_v22 }
  0xb1   :  { %v474_v57 = vpop.permute.xlu1 %473  ;;  %v469_v58 = vpop.permute.xlu0 %468 }
  0xb2   :  { %664 = vmatmul.mubr.f32.gmra.mrb[4].mxu0 %v565_v43  ;;  %676 = vmatmul.mubr.f32.gmra.mrb[4].mxu1 %v581_v44 }
  0xb3   :  { %666 = vmatprep.mubr.f32.mxu0 %v568_v45  ;;  %678 = vmatprep.mubr.f32.mxu1 %v584_v46 }
  0xb5   :  { %v484_v59 = vpop.permute.xlu1 %483  ;;  %v479_v60 = vpop.permute.xlu0 %478 }
  0xb6   :  { %667 = vmatmul.mubr.f32.gmra.mrb[6].mxu0 %v569_v47  ;;  %679 = vmatmul.mubr.f32.gmra.mrb[6].mxu1 %v585_v48 }
  0xb9   :  { %v494_v5 = vpop.permute.xlu1 %493  ;;  %v489_v6 = vpop.permute.xlu0 %488 }
  0xbd   :  { %v504_v25 = vpop.permute.xlu1 %503  ;;  %v499_v26 = vpop.permute.xlu0 %498 }
 0x17d   :  { %v659_v61 = vpop.f32.mrb[0].mxu0  ;;  %v671_v62 = vpop.f32.mrb[0].mxu1 }
 0x17e   :  { %v507_v63 = vmul.f32 %v659_v61, %v434_v49  ;;  %v515_v0 = vmul.f32 %v671_v62, %v474_v57  ;;  %v280_v1 = vpop.f32.mrb[1].mxu0  ;;  %v320_v2 = vpop.f32.mrb[1].mxu1 }
 0x17f   :  { %v506_v3 = vmul.f32 %v429_v50, %v280_v1  ;;  %v514_v4 = vmul.f32 %v469_v58, %v320_v2 }
 0x180   :  { %523 = vst [vmem:[#allocation3 + $0x8] sm:$0xff] %v507_v63  ;;  %531 = vst [vmem:[#allocation3 + $0x48] sm:$0xff] %v515_v0 }
 0x181   :  { %522 = vst [vmem:[#allocation3] sm:$0xff] %v506_v3  ;;  %530 = vst [vmem:[#allocation3 + $0x40] sm:$0xff] %v514_v4  ;;  %v662_v7 = vpop.f32.mrb[2].mxu0  ;;  %v674_v8 = vpop.f32.mrb[2].mxu1 }
 0x182   :  { %v509_v9 = vmul.f32 %v662_v7, %v444_v51  ;;  %v517_v10 = vmul.f32 %v674_v8, %v484_v59  ;;  %v290_v11 = vpop.f32.mrb[3].mxu0  ;;  %v330_v12 = vpop.f32.mrb[3].mxu1 }
 0x183   :  { %v508_v13 = vmul.f32 %v439_v52, %v290_v11  ;;  %v516_v14 = vmul.f32 %v479_v60, %v330_v12 }
 0x184   :  { %525 = vst [vmem:[#allocation3 + $0x18] sm:$0xff] %v509_v9  ;;  %533 = vst [vmem:[#allocation3 + $0x58] sm:$0xff] %v517_v10 }
 0x185   :  { %524 = vst [vmem:[#allocation3 + $0x10] sm:$0xff] %v508_v13  ;;  %532 = vst [vmem:[#allocation3 + $0x50] sm:$0xff] %v516_v14  ;;  %v665_v15 = vpop.f32.mrb[4].mxu0  ;;  %v677_v16 = vpop.f32.mrb[4].mxu1 }
 0x186   :  { %v511_v17 = vmul.f32 %v665_v15, %v454_v53  ;;  %v519_v18 = vmul.f32 %v677_v16, %v494_v5  ;;  %v300_v19 = vpop.f32.mrb[5].mxu0  ;;  %v340_v20 = vpop.f32.mrb[5].mxu1 }
 0x187   :  { %v510_v23 = vmul.f32 %v449_v54, %v300_v19  ;;  %v518_v24 = vmul.f32 %v489_v6, %v340_v20 }
 0x188   :  { %527 = vst [vmem:[#allocation3 + $0x28] sm:$0xff] %v511_v17  ;;  %535 = vst [vmem:[#allocation3 + $0x68] sm:$0xff] %v519_v18 }
 0x189   :  { %526 = vst [vmem:[#allocation3 + $0x20] sm:$0xff] %v510_v23  ;;  %534 = vst [vmem:[#allocation3 + $0x60] sm:$0xff] %v518_v24  ;;  %v668_v27 = vpop.f32.mrb[6].mxu0  ;;  %v680_v28 = vpop.f32.mrb[6].mxu1 }
 0x18a   :  { %v513_v29 = vmul.f32 %v668_v27, %v464_v55  ;;  %v521_v30 = vmul.f32 %v680_v28, %v504_v25  ;;  %v310_v31 = vpop.f32.mrb[7].mxu0  ;;  %v350_v32 = vpop.f32.mrb[7].mxu1 }
 0x18b   :  { %v512_v33 = vmul.f32 %v459_v56, %v310_v31  ;;  %v520_v34 = vmul.f32 %v499_v26, %v350_v32 }
 0x18c   :  { %529 = vst [vmem:[#allocation3 + $0x38] sm:$0xff] %v513_v29  ;;  %537 = vst [vmem:[#allocation3 + $0x78] sm:$0xff] %v521_v30 }
 0x18d   :  { %528 = vst [vmem:[#allocation3 + $0x30] sm:$0xff] %v512_v33  ;;  %536 = vst [vmem:[#allocation3 + $0x70] sm:$0xff] %v520_v34 }
 0x18e   :  { %746 = shalt.err (!%p743_p4)
}
 0x18f   :  { %s747_s21 = scalar_lea.hbm %s980_s4, 2048 }
 0x190   :  { %p748_p5 = scmp.ne.s32.totalorder %s980_s4, %s747_s21  ;;  %p751_p6 = scmp.lt.u32.totalorder %s747_s21, %s980_s4 }
 0x192   :  { %p753_p7 = pnand %p751_p6, %p748_p5 }
 0x194   :  { %756 = shalt.err (!%p753_p7)
}
 0x195   :  { %s761_s26 = smov 128   ;;  %s762_s27 = smov 8  }
 0x196   :  { %549 = dma.vmem_to_hbm [thread:$0]  %s544_s17, 2048, %s980_s4, [#allocation4], %s761_s26, %s761_s26, %s762_s27  }
 0x197   :  { %757 = dma.done.wait [#allocation4], 2048  }
 0x198   :  { %758 = vsyncadd [#allocation4], 4294965248 }
 0x199   :  { %553 = vsyncpa [#allocation4], 1 }

</bundles_post_ra>
